<compile_context>
chip_gen: v7x
topology: tpu7x:2x2x1
jax: 0.10.0
libtpu: 0.0.40
codegen_flags: <defaults>
</compile_context>

<pallas_src>
import functools

import jax
import jax.numpy as jnp
from jax import lax
from jax.experimental import pallas as pl
from jax.experimental.pallas import tpu as pltpu

NUM_CLASSES = 10


def taylor_loss_kernel(coef_ref, tgt_ref, logits_ref, out_ref, *, batch_size):
    # Raw Taylor coefficients x[0..7] (SMEM scalars).  Derived constants are
    # recomputed per grid step on the scalar unit (negligible).
    x0 = coef_ref[0]
    x1 = coef_ref[1]
    x2 = coef_ref[2]
    x3 = coef_ref[3]
    x4 = coef_ref[4]
    x5 = coef_ref[5]
    x6 = coef_ref[6]
    x7 = coef_ref[7]

    c3 = x3 * 0.5
    c4 = x4 * (1.0 / 6.0)
    c6 = x6 * 0.5
    c7 = x7 * 0.5

    # t is one-hot => t_d = t - x1 takes only two values.
    d_n = -x1          # non-target classes
    d_t = 1.0 - x1     # target class

    def poly_t(d):     # t-only terms for one element with t_d = d
        d2 = d * d
        return d * x2 + d2 * c3 + d2 * d * c4

    # Sum of the t-only terms over the C classes (same for every batch element).
    row_const = (NUM_CLASSES - 1) * poly_t(d_n) + poly_t(d_t)

    # Cross-term coefficients: per class the cross terms are a*o_d + b*o_d^2.
    a_n = d_n * x5 + (d_n * d_n) * c6
    a_t = d_t * x5 + (d_t * d_t) * c6
    b_n = d_n * c7
    b_t = d_t * c7
    da = a_t - a_n
    db = b_t - b_n

    # Fold the class-sum identities (sum_c o_d = 1 - C*x0, etc.) into a scalar.
    base = (row_const
            + a_n * (1.0 - NUM_CLASSES * x0)
            + b_n * (NUM_CLASSES * x0 * x0 - 2.0 * x0))

    logits = logits_ref[...].astype(jnp.float32)          # (C, tb)
    tgt = tgt_ref[...]                                    # (1, tb) int32
    tb = logits.shape[1]

    # Softmax building blocks (class axis = sublanes).  Only exp/e^2/select are
    # full (C, tb) VPU/EUP work; the reductions ride the XLU slot.
    m = jnp.max(logits, axis=0, keepdims=True)            # (1, tb)
    e = jnp.exp(logits - m)                               # (C, tb)
    s = jnp.sum(e, axis=0, keepdims=True)                 # (1, tb)
    s2 = jnp.sum(e * e, axis=0, keepdims=True)            # (1, tb)

    cls = lax.broadcasted_iota(jnp.int32, logits.shape, 0)
    e_t = jnp.sum(jnp.where(cls == tgt, e, 0.0), axis=0, keepdims=True)  # (1, tb)

    # One exact reciprocal on the (1, tb) denominator, then multiplies.
    inv = pl.reciprocal(s, approx=False)                  # (1, tb)
    sum_sm2 = s2 * inv * inv                              # sum_c softmax^2
    o_d_t = e_t * inv - x0                                # softmax at target - x0

    per_elem = base + b_n * sum_sm2 + da * o_d_t + db * (o_d_t * o_d_t)  # (1, tb)

    # Exclude padded lanes of a partial last tile with a select (garbage lanes
    # can hold NaN/Inf after softmax of garbage logits; 0/1-mask multiply would
    # propagate NaN).
    valid = jnp.minimum(batch_size - pl.program_id(0) * tb, tb)
    lane = lax.broadcasted_iota(jnp.int32, per_elem.shape, 1)
    masked = jnp.where(lane < valid, per_elem, 0.0)

    # Reduce the whole tile to one f32; emit a 128-lane block (scalar at lane 0)
    # so the HBM writeback is 512 B/tile instead of 4*tb bytes.
    tile_sum = jnp.sum(masked, axis=1, keepdims=True)     # (1, 1)
    out_lane = lax.broadcasted_iota(jnp.int32, (1, 128), 1)
    out_ref[...] = jnp.where(out_lane == 0, tile_sum, 0.0)


def _pick_batch_tile(batch, itemsize):
    """Largest lane-aligned batch tile that fits the VMEM budget."""
    if batch <= 128:
        return batch
    # Double-buffered I/O bytes per lane (logits in wire dtype + int32 target)
    # plus a conservative estimate of in-kernel f32 temporaries (a few (C, tb)
    # arrays for cast/exp/e^2/select and a handful of (1, tb) arrays).
    io_per_lane = 2 * (NUM_CLASSES * itemsize + 4)
    tmp_per_lane = 4 * NUM_CLASSES * 4 + 8 * 4
    budget = 20 * 1024 * 1024              # leaves headroom under the 32 MiB limit below
    max_tb = (budget // (io_per_lane + tmp_per_lane)) // 128 * 128
    max_tb = max(128, min(max_tb, 128 * 1024))
    return min(max_tb, (batch // 128) * 128)


def taylor_loss(logits, target, coefs, *, class_major=False):
    """logits: (B, C) float (any dtype), or (C, B) if class_major=True;
    target: (B,) int; coefs: (8,) -> scalar loss."""
    if class_major:
        logits_cb = logits                  # already (C, B): no extra HBM traffic
        C, B = logits.shape
    else:
        B, C = logits.shape
        # TODO(synk): this transpose costs an extra HBM read+write of the logits;
        # have the producer emit (C, B) and pass class_major=True to avoid it.
        logits_cb = logits.T                # (C, B), kept in native dtype
    assert C == NUM_CLASSES

    tgt2d = target.astype(jnp.int32).reshape(1, B)     # (1, B)

    tb = _pick_batch_tile(B, jnp.dtype(logits.dtype).itemsize)
    num_tiles = pl.cdiv(B, tb)

    partials = pl.pallas_call(
        functools.partial(taylor_loss_kernel, batch_size=B),
        out_shape=jax.ShapeDtypeStruct((1, num_tiles * 128), jnp.float32),
        grid_spec=pltpu.PrefetchScalarGridSpec(
            num_scalar_prefetch=0,
            grid=(num_tiles,),
            in_specs=[
                pl.BlockSpec(memory_space=pltpu.MemorySpace.SMEM),   # coefs (8,)
                pl.BlockSpec((1, tb), lambda i: (0, i)),             # target ids (1, B)
                pl.BlockSpec((NUM_CLASSES, tb), lambda i: (0, i)),   # logits (C, B)
            ],
            out_specs=pl.BlockSpec((1, 128), lambda i: (0, i)),      # per-tile sums
        ),
        compiler_params=pltpu.CompilerParams(
            dimension_semantics=("parallel",),
            vmem_limit_bytes=32 * 1024 * 1024,
        ),
    )(coefs.astype(jnp.float32), tgt2d, logits_cb)

    # Only lane 0 of each tile block is nonzero; sum everything and apply -1/C.
    return jnp.sum(partials) * (-1.0 / NUM_CLASSES)


def taylor_loss_ref(logits, target, coefs):
    """Pure-JAX reference mirroring the PyTorch forward term-by-term (float32)."""
    x = coefs.astype(jnp.float32)
    t = jax.nn.one_hot(target, NUM_CLASSES, dtype=jnp.float32)
    o = jax.nn.softmax(logits.astype(jnp.float32), axis=1)
    t_d = t - x[1]
    o_d = o - x[0]
    term = (t_d * x[2]
            + t_d ** 2 * (x[3] * 0.5)
            + t_d ** 3 * (x[4] * (1.0 / 6.0))
            + o_d * t_d * x[5]
            + o_d * t_d ** 2 * (x[6] * 0.5)
            + o_d ** 2 * t_d * (x[7] * 0.5))
    return jnp.sum(term) * (-1.0 / NUM_CLASSES)


if __name__ == "__main__":
    key = jax.random.PRNGKey(0)
    k_logits, k_target, k_coef = jax.random.split(key, 3)

    # Small shapes consistent with the module: batch of logits over 10 classes.
    B = 16
    logits = jax.random.normal(k_logits, (B, NUM_CLASSES), dtype=jnp.float32)
    target = jax.random.randint(k_target, (B,), 0, NUM_CLASSES, dtype=jnp.int32)
    coefs = 0.1 * jax.random.normal(k_coef, (8,), dtype=jnp.float32)   # x[0..7]

    out = jax.block_until_ready(taylor_loss(logits, target, coefs))
    ref = jax.block_until_ready(taylor_loss_ref(logits, target, coefs))
    assert jnp.allclose(out, ref, rtol=1e-4, atol=1e-5), (out, ref)

    # Exercise the multi-tile / partial-last-tile path and the native-bf16 path.
    B2 = 130
    logits2 = jax.random.normal(jax.random.PRNGKey(1), (B2, NUM_CLASSES),
                                dtype=jnp.float32).astype(jnp.bfloat16)
    target2 = jax.random.randint(jax.random.PRNGKey(2), (B2,), 0, NUM_CLASSES,
                                 dtype=jnp.int32)
    out2 = jax.block_until_ready(taylor_loss(logits2, target2, coefs))
    ref2 = jax.block_until_ready(taylor_loss_ref(logits2, target2, coefs))
    assert jnp.allclose(out2, ref2, rtol=1e-4, atol=1e-5), (out2, ref2)

    # Exercise the class-major (no wrapper transpose) path.
    out3 = jax.block_until_ready(taylor_loss(logits.T, target, coefs, class_major=True))
    assert jnp.allclose(out3, ref, rtol=1e-4, atol=1e-5), (out3, ref)

    print("KERNEL_OK")
</pallas_src>

<mosaic_0001>
module attributes {stable_mosaic.version = 11 : i64} {
  func.func @taylor_loss_kernel(%arg0: i32, %arg1: memref<8xf32, #tpu.memory_space<smem>>, %arg2: memref<1x16xi32, #tpu.memory_space<vmem>>, %arg3: memref<10x16xf32, #tpu.memory_space<vmem>>, %arg4: memref<1x128xf32, #tpu.memory_space<vmem>>) attributes {dimension_semantics = [#tpu.dimension_semantics<parallel>], iteration_bounds = array<i64: 1>, scalar_prefetch = 0 : i64, scratch_operands = 0 : i64, tpu.core_type = #tpu.core_type<tc>, window_params = [{transform_indices = @transform_0, window_bounds = array<i64: 8>}, {transform_indices = @transform_1, window_bounds = array<i64: 1, 16>}, {transform_indices = @transform_2, window_bounds = array<i64: 10, 16>}, {transform_indices = @transform_3, window_bounds = array<i64: 1, 128>}]} {
    %c0 = arith.constant 0 : index
    %0 = memref.load %arg1[%c0] : memref<8xf32, #tpu.memory_space<smem>>
    %c1 = arith.constant 1 : index
    %1 = memref.load %arg1[%c1] : memref<8xf32, #tpu.memory_space<smem>>
    %c2 = arith.constant 2 : index
    %2 = memref.load %arg1[%c2] : memref<8xf32, #tpu.memory_space<smem>>
    %c3 = arith.constant 3 : index
    %3 = memref.load %arg1[%c3] : memref<8xf32, #tpu.memory_space<smem>>
    %c4 = arith.constant 4 : index
    %4 = memref.load %arg1[%c4] : memref<8xf32, #tpu.memory_space<smem>>
    %c5 = arith.constant 5 : index
    %5 = memref.load %arg1[%c5] : memref<8xf32, #tpu.memory_space<smem>>
    %c6 = arith.constant 6 : index
    %6 = memref.load %arg1[%c6] : memref<8xf32, #tpu.memory_space<smem>>
    %c7 = arith.constant 7 : index
    %7 = memref.load %arg1[%c7] : memref<8xf32, #tpu.memory_space<smem>>
    %cst = arith.constant 5.000000e-01 : f32
    %8 = arith.mulf %3, %cst : f32
    %cst_0 = arith.constant 0.166666672 : f32
    %9 = arith.mulf %4, %cst_0 : f32
    %cst_1 = arith.constant 5.000000e-01 : f32
    %10 = arith.mulf %6, %cst_1 : f32
    %cst_2 = arith.constant 5.000000e-01 : f32
    %11 = arith.mulf %7, %cst_2 : f32
    %cst_3 = arith.constant 0.000000e+00 : f32
    %12 = arith.subf %cst_3, %1 : f32
    %cst_4 = arith.constant 1.000000e+00 : f32
    %13 = arith.subf %cst_4, %1 : f32
    %14 = arith.mulf %12, %12 : f32
    %15 = arith.mulf %12, %2 : f32
    %16 = arith.mulf %14, %8 : f32
    %17 = arith.addf %15, %16 : f32
    %18 = arith.mulf %14, %12 : f32
    %19 = arith.mulf %18, %9 : f32
    %20 = arith.addf %17, %19 : f32
    %cst_5 = arith.constant 9.000000e+00 : f32
    %21 = arith.mulf %cst_5, %20 : f32
    %22 = arith.mulf %13, %13 : f32
    %23 = arith.mulf %13, %2 : f32
    %24 = arith.mulf %22, %8 : f32
    %25 = arith.addf %23, %24 : f32
    %26 = arith.mulf %22, %13 : f32
    %27 = arith.mulf %26, %9 : f32
    %28 = arith.addf %25, %27 : f32
    %29 = arith.addf %21, %28 : f32
    %30 = arith.mulf %12, %5 : f32
    %31 = arith.mulf %12, %12 : f32
    %32 = arith.mulf %31, %10 : f32
    %33 = arith.addf %30, %32 : f32
    %34 = arith.mulf %13, %5 : f32
    %35 = arith.mulf %13, %13 : f32
    %36 = arith.mulf %35, %10 : f32
    %37 = arith.addf %34, %36 : f32
    %38 = arith.mulf %12, %11 : f32
    %39 = arith.mulf %13, %11 : f32
    %40 = arith.subf %37, %33 : f32
    %41 = arith.subf %39, %38 : f32
    %cst_6 = arith.constant 1.000000e+01 : f32
    %42 = arith.mulf %cst_6, %0 : f32
    %cst_7 = arith.constant 1.000000e+00 : f32
    %43 = arith.subf %cst_7, %42 : f32
    %44 = arith.mulf %33, %43 : f32
    %45 = arith.addf %29, %44 : f32
    %cst_8 = arith.constant 1.000000e+01 : f32
    %46 = arith.mulf %cst_8, %0 : f32
    %47 = arith.mulf %46, %0 : f32
    %cst_9 = arith.constant 2.000000e+00 : f32
    %48 = arith.mulf %cst_9, %0 : f32
    %49 = arith.subf %47, %48 : f32
    %50 = arith.mulf %38, %49 : f32
    %51 = arith.addf %45, %50 : f32
    %c0_10 = arith.constant 0 : index
    %c0_11 = arith.constant 0 : index
    %52 = vector.load %arg3[%c0_10, %c0_11] : memref<10x16xf32, #tpu.memory_space<vmem>>, vector<10x16xf32>
    %c0_12 = arith.constant 0 : index
    %c0_13 = arith.constant 0 : index
    %53 = vector.load %arg2[%c0_12, %c0_13] : memref<1x16xi32, #tpu.memory_space<vmem>>, vector<1x16xi32>
    %cst_14 = arith.constant dense<0xFF800000> : vector<16xf32>
    %54 = vector.multi_reduction <maximumf>, %52, %cst_14 [0] : vector<10x16xf32> to vector<16xf32>
    %55 = vector.shape_cast %54 : vector<16xf32> to vector<1x16xf32>
    %56 = vector.broadcast %55 : vector<1x16xf32> to vector<10x16xf32>
    %57 = arith.subf %52, %56 : vector<10x16xf32>
    %58 = math.exp %57 : vector<10x16xf32>
    %cst_15 = arith.constant dense<0.000000e+00> : vector<16xf32>
    %59 = vector.multi_reduction <add>, %58, %cst_15 [0] : vector<10x16xf32> to vector<16xf32>
    %60 = vector.shape_cast %59 : vector<16xf32> to vector<1x16xf32>
    %61 = arith.mulf %58, %58 : vector<10x16xf32>
    %cst_16 = arith.constant dense<0.000000e+00> : vector<16xf32>
    %62 = vector.multi_reduction <add>, %61, %cst_16 [0] : vector<10x16xf32> to vector<16xf32>
    %63 = vector.shape_cast %62 : vector<16xf32> to vector<1x16xf32>
    %64 = tpu.iota {dimensions = array<i32: 0>} : vector<10x16xi32>
    %65 = vector.broadcast %53 : vector<1x16xi32> to vector<10x16xi32>
    %66 = arith.cmpi eq, %64, %65 : vector<10x16xi32>
    %cst_17 = arith.constant 0.000000e+00 : f32
    %67 = vector.broadcast %cst_17 : f32 to vector<10x16xf32>
    %68 = arith.select %66, %58, %67 : vector<10x16xi1>, vector<10x16xf32>
    %cst_18 = arith.constant dense<0.000000e+00> : vector<16xf32>
    %69 = vector.multi_reduction <add>, %68, %cst_18 [0] : vector<10x16xf32> to vector<16xf32>
    %70 = vector.shape_cast %69 : vector<16xf32> to vector<1x16xf32>
    %71 = tpu.reciprocal %60 : vector<1x16xf32> -> vector<1x16xf32>
    %72 = arith.mulf %63, %71 : vector<1x16xf32>
    %73 = arith.mulf %72, %71 : vector<1x16xf32>
    %74 = arith.mulf %70, %71 : vector<1x16xf32>
    %75 = vector.broadcast %0 : f32 to vector<1x16xf32>
    %76 = arith.subf %74, %75 : vector<1x16xf32>
    %77 = vector.broadcast %38 : f32 to vector<1x16xf32>
    %78 = arith.mulf %77, %73 : vector<1x16xf32>
    %79 = vector.broadcast %51 : f32 to vector<1x16xf32>
    %80 = arith.addf %79, %78 : vector<1x16xf32>
    %81 = vector.broadcast %40 : f32 to vector<1x16xf32>
    %82 = arith.mulf %81, %76 : vector<1x16xf32>
    %83 = arith.addf %80, %82 : vector<1x16xf32>
    %84 = arith.mulf %76, %76 : vector<1x16xf32>
    %85 = vector.broadcast %41 : f32 to vector<1x16xf32>
    %86 = arith.mulf %85, %84 : vector<1x16xf32>
    %87 = arith.addf %83, %86 : vector<1x16xf32>
    %c16_i32 = arith.constant 16 : i32
    %88 = arith.muli %arg0, %c16_i32 : i32
    %c16_i32_19 = arith.constant 16 : i32
    %89 = arith.subi %c16_i32_19, %88 : i32
    %c16_i32_20 = arith.constant 16 : i32
    %90 = arith.minsi %89, %c16_i32_20 : i32
    %91 = tpu.iota {dimensions = array<i32: 1>} : vector<1x16xi32>
    %92 = vector.broadcast %90 : i32 to vector<1x16xi32>
    %93 = arith.cmpi slt, %91, %92 : vector<1x16xi32>
    %cst_21 = arith.constant 0.000000e+00 : f32
    %94 = vector.broadcast %cst_21 : f32 to vector<1x16xf32>
    %95 = arith.select %93, %87, %94 : vector<1x16xi1>, vector<1x16xf32>
    %cst_22 = arith.constant dense<0.000000e+00> : vector<1xf32>
    %96 = vector.multi_reduction <add>, %95, %cst_22 [1] : vector<1x16xf32> to vector<1xf32>
    %97 = vector.shape_cast %96 : vector<1xf32> to vector<1x1xf32>
    %98 = tpu.iota {dimensions = array<i32: 1>} : vector<1x128xi32>
    %c0_i32 = arith.constant 0 : i32
    %99 = vector.broadcast %c0_i32 : i32 to vector<1x128xi32>
    %100 = arith.cmpi eq, %98, %99 : vector<1x128xi32>
    %cst_23 = arith.constant 0.000000e+00 : f32
    %101 = vector.shape_cast %97 : vector<1x1xf32> to vector<1x1xf32>
    %102 = vector.broadcast %101 : vector<1x1xf32> to vector<1x128xf32>
    %103 = vector.broadcast %cst_23 : f32 to vector<1x128xf32>
    %104 = arith.select %100, %102, %103 : vector<1x128xi1>, vector<1x128xf32>
    %c0_24 = arith.constant 0 : index
    %c0_25 = arith.constant 0 : index
    %105 = vector.load %arg4[%c0_24, %c0_25] : memref<1x128xf32, #tpu.memory_space<vmem>>, vector<1x128xf32>
    tpu.vector_store %arg4[%c0_24, %c0_25], %104 {strides = array<i32>} : memref<1x128xf32, #tpu.memory_space<vmem>>, vector<1x128xf32>,
    return
  }
  func.func @transform_0(%arg0: i32) -> i32 {
    %c0_i32 = arith.constant 0 : i32
    %c0_i32_0 = arith.constant 0 : i32
    return %c0_i32 : i32
  }
  func.func @transform_1(%arg0: i32) -> (i32, i32) {
    %c0_i32 = arith.constant 0 : i32
    %c0_i32_0 = arith.constant 0 : i32
    return %c0_i32, %arg0 : i32, i32
  }
  func.func @transform_2(%arg0: i32) -> (i32, i32) {
    %c0_i32 = arith.constant 0 : i32
    %c0_i32_0 = arith.constant 0 : i32
    return %c0_i32, %arg0 : i32, i32
  }
  func.func @transform_3(%arg0: i32) -> (i32, i32) {
    %c0_i32 = arith.constant 0 : i32
    %c0_i32_0 = arith.constant 0 : i32
    return %c0_i32, %arg0 : i32, i32
  }
}

</mosaic_0001>

<bundles_post_ra>
// kernel: tpu_custom_call.1
= control target key start
LH: loop header
LB: loop body
LE: loop exit
PB: predicated region body
PF: predicated region fallthrough
CT: control target
= control target key end

     0   :  { %8 = vsyncpa [#allocation5], 0  ;;  %s414_s0 = inlined_call_operand.hbm [shape: f32[8], index: 0, kind: input, shape index: {}]   ;;  %s415_s1 = inlined_call_operand.vmem [shape: s32[1,16], index: 1, kind: input, shape index: {}]   ;;  %s416_s2 = inlined_call_operand.hbm [shape: f32[10,16], index: 2, kind: input, shape index: {}]   ;;  %s417_s3 = inlined_call_operand.hbm [shape: f32[1,128], index: 3, kind: output, shape index: {}]  }
   0x1   :  { %9 = vsyncpa [#allocation3], 0 }
   0x2   :  { %10 = vsyncpa [#allocation4], 0  ;;  %s216_s14 = scalar_lea.hbm %s414_s0, 16 }
   0x3   :  { %p217_p0 = scmp.ne.s32.totalorder %s414_s0, %s216_s14  ;;  %p220_p1 = scmp.lt.u32.totalorder %s216_s14, %s414_s0 }
   0x5   :  { %p222_p2 = pnand %p220_p1, %p217_p0 }
   0x7   :  { %225 = shalt.err (!%p222_p2)
}
   0x8   :  { %s276_s19 = smov [#allocation2]   ;;  %s277_s22 = smov [#allocation6]  }
   0x9   :  { %18 = dma.hbm_to_smem %s414_s0, 16, %s276_s19, [#allocation5]  }
   0xa   :  { %s26_s23 = sshll.u32 %s277_s22, 4  ;;  %s226_s26 = scalar_lea.hbm %s416_s2, 256  ;;  %s27_s23 = int_to_ptr.vmem [resolvable:$true] %s26_s23 }
   0xb   :  { %p227_p3 = scmp.ne.s32.totalorder %s416_s2, %s226_s26  ;;  %p230_p4 = scmp.lt.u32.totalorder %s226_s26, %s416_s2 }
   0xd   :  { %p232_p5 = pnand %p230_p4, %p227_p3 }
   0xf   :  { %235 = shalt.err (!%p232_p5)
}
  0x10   :  { %s236_s4 = scalar_lea.vmem %s27_s23, 256  ;;  %p241_p7 = scmp.lt.s32.totalorder %s27_s23, %s27_s23 }
  0x11   :  { %p237_p6 = scmp.ne.s32.totalorder %s27_s23, %s236_s4  ;;  %p242_p8 = scmp.lt.s32.totalorder %s236_s4, %s236_s4 }
  0x13   :  { %p243_p9 = por %p242_p8, %p241_p7 }
  0x15   :  { %p244_p10 = pnand %p243_p9, %p237_p6 }
  0x17   :  { %247 = shalt.err (!%p244_p10)
}
  0x18   :  { %s278_s0 = smov 128   ;;  %s279_s5 = smov 8  }
  0x19   :  { %32 = dma.hbm_to_vmem [thread:$0]  %s416_s2, 256, %s27_s23, [#allocation3], %s278_s0, %s278_s0, %s279_s5  }
  0x1a   :  { %270 = dma.done.wait [#allocation5], 16  }
  0x1b   :  { %271 = vsyncadd [#allocation5], 4294967280 }
  0x1c   :  { %272 = dma.done.wait [#allocation3], 256  }
  0x1d   :  { %273 = vsyncadd [#allocation3], 4294967040 }
  0x1e   :  { %39 = sfence }
  0x1f   :  { %v89_v0 = vld [vmem:[#allocation6] sm:$0xff]  ;;  %vm92_vm0 = vcmask 130048   ;;  %v90_v1 = vld [vmem:[#allocation6 + $0x8] sm:$0x3]  ;;  %vm94_vm1 = vcmask 123904   ;;  %s197_s2 = sld [smem:[#allocation2 + $0x1]]  ;;  %v129_v13 = vlaneseq }
  0x20   :  { %v93_v2 = vsel %vm92_vm0, %v89_v0, -inf  ;;  %v95_v3 = vsel %vm94_vm1, %v90_v1, -inf  ;;  %s327_s8 = sld [smem:[#allocation2 + $0x3]]  ;;  %s329_s9 = sld [smem:[#allocation2 + $0x4]]  ;;  %v204_v17 = vld [vmem:[%s415_s1] ss:$0 sm:$0xff] }
  0x21   :  { %v96_v4 = vmax.f32 %v93_v2, %v95_v3  ;;  %s331_s10 = sld [smem:[#allocation2 + $0x2]]  ;;  %v130_v16 = vshrl.u32 %v129_v13, 7  ;;  %s349_s19 = sld [smem:[#allocation2 + $0x6]] }
  0x22   :  { %s353_s21 = sld [smem:[#allocation2]]  ;;  %s363_s23 = sld [smem:[#allocation2 + $0x5]] }
  0x23   :  { %v97_v5 = vrot.slane %v96_v4, 4  ;;  %v131_v18 = vadd.s32 8, %v130_v16  ;;  %vm136_vm2 = vcmp.eq.s32.totalorder %v130_v16, %v204_v17  ;;  %s373_s25 = sld [smem:[#allocation2 + $0x7]] }
  0x25   :  { %v98_v6 = vmax.f32 %v96_v4, %v97_v5  ;;  %s333_s11 = ssub.f32 0.0, %s197_s2  ;;  %vm137_vm3 = vcmp.eq.s32.totalorder %v131_v18, %v204_v17 }
  0x26   :  { %s48_s15 = smul.f32 0.5, %s327_s8  ;;  %s345_s17 = ssub.f32 1.0, %s197_s2 }
  0x27   :  { %v99_v7 = vrot.slane %v98_v6, 2  ;;  %s338_s12 = smul.f32 %s333_s11, %s333_s11 }
  0x28   :  { %s49_s16 = smul.f32 0.16666667, %s329_s9  ;;  %v153_v53 = vstv %s353_s21 }
  0x29   :  { %v100_v8 = vmax.f32 %v98_v6, %v99_v7  ;;  %s55_s18 = smul.f32 %s331_s10, %s333_s11 }
  0x2a   :  { %s58_s20 = smul.f32 %s338_s12, %s333_s11 }
  0x2b   :  { %v101_v9 = vrot.slane %v100_v8, 1  ;;  %s56_s22 = smul.f32 %s338_s12, %s48_s15 }
  0x2c   :  { %s360_s1 = smul.f32 %s345_s17, %s345_s17 }
  0x2d   :  { %v102_v10 = vmax.f32 %v100_v8, %v101_v9  ;;  %s369_s24 = smul.f32 %s58_s20, %s49_s16  ;;  %s57_s27 = sadd.f32 %s56_s22, %s55_s18 }
  0x2e   :  { %s63_s26 = smul.f32 %s331_s10, %s345_s17 }
  0x2f   :  { %v103_v11 = vsub.f32 %v89_v0, %v102_v10  ;;  %v104_v12 = vsub.f32 %v90_v1, %v102_v10  ;;  %s66_s28 = smul.f32 %s360_s1, %s345_s17  ;;  %s60_s0 = sadd.f32 %s369_s24, %s57_s27  ;;  %v171_v1 = vand.u32 127, %v129_v13 }
  0x30   :  { %s64_s29 = smul.f32 %s360_s1, %s48_s15 }
  0x31   :  { %v105_v14 = vmul.f32 1.442695, %v103_v11  ;;  %v107_v15 = vmul.f32 1.442695, %v104_v12  ;;  %s50_s30 = smul.f32 0.5, %s349_s19  ;;  %vm173_vm4 = vcmp.lt.s32.totalorder %v171_v1, 16 }
  0x32   :  { %s80_s4 = smul.f32 10.0, %s353_s21  ;;  %s65_s6 = sadd.f32 %s64_s29, %s63_s26  ;;  %vm178_vm5 = vcmp.eq.s32.totalorder %v171_v1, 0 }
  0x33   :  { %210 = vpow2.f32 %v105_v14  ;;  %s67_s5 = smul.f32 %s66_s28, %s49_s16 }
  0x34   :  { %212 = vpow2.f32 %v107_v15  ;;  %s70_s7 = smul.f32 %s363_s23, %s333_s11  ;;  %s81_s13 = ssub.f32 1.0, %s80_s4 }
  0x35   :  { %s71_s2 = smul.f32 %s338_s12, %s50_s30  ;;  %s68_s14 = sadd.f32 %s67_s5, %s65_s6 }
  0x36   :  { %s51_s8 = smul.f32 0.5, %s373_s25 }
  0x37   :  { %s61_s10 = smul.f32 9.0, %s60_s0  ;;  %s72_s15 = sadd.f32 %s71_s2, %s70_s7 }
  0x38   :  { %s84_s9 = smul.f32 %s80_s4, %s353_s21 }
  0x39   :  { %s85_s16 = smul.f32 2.0, %s353_s21  ;;  %s69_s12 = sadd.f32 %s68_s14, %s61_s10 }
  0x3a   :  { %s73_s18 = smul.f32 %s363_s23, %s345_s17 }
  0x3b   :  { %s74_s19 = smul.f32 %s360_s1, %s50_s30  ;;  %s86_s24 = ssub.f32 %s84_s9, %s85_s16 }
  0x3c   :  { %s76_s20 = smul.f32 %s333_s11, %s51_s8  ;;  %s280_s11 = smov [#allocation7]  }
  0x3d   :  { %v211_v19 = vpop.eup %210  ;;  %s82_s22 = smul.f32 %s81_s13, %s72_s15  ;;  %s75_s25 = sadd.f32 %s74_s19, %s73_s18 }
  0x3e   :  { %v213_v20 = vpop.eup %212  ;;  %v109_v21 = vsel %vm92_vm0, %v211_v19, 0.0  ;;  %v118_v22 = vmul.f32 %v211_v19, %v211_v19  ;;  %v138_v23 = vsel %vm136_vm2, %v211_v19, 0.0  ;;  %s77_s26 = smul.f32 %s345_s17, %s51_s8  ;;  %v155_v56 = vstv %s76_s20  ;;  %s187_s17 = sshll.u32 %s280_s11, 4  ;;  %s188_s17 = int_to_ptr.vmem [resolvable:$true] %s187_s17 }
  0x3f   :  { %v110_v24 = vsel %vm94_vm1, %v213_v20, 0.0  ;;  %v119_v25 = vmul.f32 %v213_v20, %v213_v20  ;;  %v139_v26 = vsel %vm137_vm3, %v213_v20, 0.0  ;;  %v140_v27 = vsel %vm92_vm0, %v138_v23, 0.0  ;;  %s83_s27 = sadd.f32 %s82_s22, %s69_s12  ;;  %s87_s28 = smul.f32 %s86_s24, %s76_s20 }
  0x40   :  { %v111_v28 = vadd.f32 %v110_v24, %v109_v21  ;;  %v120_v29 = vsel %vm92_vm0, %v118_v22, 0.0  ;;  %v141_v30 = vsel %vm94_vm1, %v139_v26, 0.0  ;;  %s78_s29 = ssub.f32 %s75_s25, %s72_s15  ;;  %s248_s21 = scalar_lea.vmem %s188_s17, 16 }
  0x41   :  { %v121_v31 = vsel %vm94_vm1, %v119_v25, 0.0  ;;  %v142_v32 = vadd.f32 %v141_v30, %v140_v27  ;;  %s79_s4 = ssub.f32 %s77_s26, %s76_s20  ;;  %p249_p11 = scmp.ne.s32.totalorder %s188_s17, %s248_s21 }
  0x42   :  { %v112_v33 = vrot.slane %v111_v28, 4  ;;  %v122_v34 = vadd.f32 %v121_v31, %v120_v29  ;;  %s88_s23 = sadd.f32 %s87_s28, %s83_s27  ;;  %v159_v57 = vstv %s78_s29  ;;  %s252_s1 = scalar_lea.vmem %s188_s17, 32 }
  0x43   :  { %v143_v35 = vrot.slane %v142_v32, 4  ;;  %v163_v61 = vstv %s79_s4  ;;  %p253_p12 = scmp.lt.s32.totalorder %s188_s17, %s188_s17  ;;  %p254_p13 = scmp.lt.s32.totalorder %s252_s1, %s248_s21 }
  0x44   :  { %v113_v36 = vadd.f32 %v112_v33, %v111_v28  ;;  %v123_v37 = vrot.slane %v122_v34, 4  ;;  %v157_v60 = vstv %s88_s23 }
  0x45   :  { %v144_v38 = vadd.f32 %v143_v35, %v142_v32  ;;  %p255_p0 = por %p254_p13, %p253_p12 }
  0x46   :  { %v114_v39 = vrot.slane %v113_v36, 2  ;;  %v124_v40 = vadd.f32 %v123_v37, %v122_v34 }
  0x47   :  { %v145_v43 = vrot.slane %v144_v38, 2  ;;  %p256_p1 = pnand %p255_p0, %p249_p11 }
  0x48   :  { %v115_v41 = vadd.f32 %v114_v39, %v113_v36  ;;  %v125_v42 = vrot.slane %v124_v40, 2 }
  0x49   :  { %v146_v47 = vadd.f32 %v145_v43, %v144_v38 }
  0x4a   :  { %v116_v44 = vrot.slane %v115_v41, 1  ;;  %v126_v46 = vadd.f32 %v125_v42, %v124_v40 }
  0x4b   :  { %v147_v49 = vrot.slane %v146_v47, 1 }
  0x4c   :  { %v117_v45 = vadd.f32 %v116_v44, %v115_v41  ;;  %v127_v48 = vrot.slane %v126_v46, 1 }
  0x4d   :  { %v148_v51 = vadd.f32 %v147_v49, %v146_v47 }
  0x4e   :  { %214 = vrcp.f32 %v117_v45  ;;  %v128_v50 = vadd.f32 %v127_v48, %v126_v46 }
  0x58   :  { %v215_v52 = vpop.eup %214 }
  0x59   :  { %v150_v54 = vmul.f32 %v215_v52, %v128_v50  ;;  %v152_v55 = vmul.f32 %v215_v52, %v148_v51 }
  0x5b   :  { %v151_v58 = vmul.f32 %v215_v52, %v150_v54  ;;  %v154_v59 = vsub.f32 %v152_v55, %v153_v53 }
  0x5d   :  { %v156_v62 = vmul.f32 %v155_v56, %v151_v58  ;;  %v160_v63 = vmul.f32 %v159_v57, %v154_v59  ;;  %v162_v0 = vmul.f32 %v154_v59, %v154_v59 }
  0x5f   :  { %v158_v2 = vadd.f32 %v157_v60, %v156_v62  ;;  %v164_v3 = vmul.f32 %v163_v61, %v162_v0 }
  0x61   :  { %v161_v4 = vadd.f32 %v160_v63, %v158_v2 }
  0x63   :  { %v165_v5 = vadd.f32 %v164_v3, %v161_v4 }
  0x65   :  { %v174_v6 = vsel %vm173_vm4, %v165_v5, 0.0 }
  0x66   :  { %v175_v7 = vsel %vm92_vm0, %v174_v6, 0.0 }
  0x67   :  { %176 = vadd.xlane.f32.xlu0 %v175_v7 }
  0xf4   :  { %v177_v8 = vpop.xlane.xlu0 %176 }
  0xf5   :  { %v179_v9 = vsel %vm178_vm5, %v177_v8, 0.0 }
  0xf6   :  { %180 = vst [vmem:[#allocation7] sm:$0x1] %v179_v9 }
  0xf7   :  { %259 = shalt.err (!%p256_p1)
}
  0xf8   :  { %s260_s5 = scalar_lea.hbm %s417_s3, 16 }
  0xf9   :  { %p261_p2 = scmp.ne.s32.totalorder %s417_s3, %s260_s5  ;;  %p264_p3 = scmp.lt.u32.totalorder %s260_s5, %s417_s3 }
  0xfb   :  { %p266_p4 = pnand %p264_p3, %p261_p2 }
  0xfd   :  { %269 = shalt.err (!%p266_p4)
}
  0xfe   :  { %190 = dma.vmem_to_hbm [thread:$0]  %s188_s17, 16, %s417_s3, [#allocation4]  }
  0xff   :  { %274 = dma.done.wait [#allocation4], 16  }
 0x100   :  { %275 = vsyncadd [#allocation4], 4294967280 }
 0x101   :  { %194 = vsyncpa [#allocation3], 1 }
 0x102   :  { %195 = vsyncpa [#allocation4], 1 }
 0x103   :  { %196 = vsyncpa [#allocation5], 1 }

</bundles_post_ra>
